<compile_context>
chip_gen: v5e
topology: v5e:2x2
jax: 0.10.0
libtpu: 0.0.40
codegen_flags: <defaults>
</compile_context>

<pallas_src>
import functools

import jax
import jax.numpy as jnp
from jax.experimental import pallas as pl
from jax.experimental.pallas import tpu as pltpu

_VMEM_LIMIT = 48 * 1024 * 1024


def _round_up(x, m):
    return ((x + m - 1) // m) * m


def _pick_tile(n, target, multiple):
    """Largest divisor of n that is <= target and a multiple of `multiple`; else full n."""
    for t in range(min(target, n), multiple - 1, -1):
        if n % t == 0 and t % multiple == 0:
            return t
    return n


def _pad_to(m, shape):
    pads = tuple((0, s - d) for d, s in zip(m.shape, shape))
    return m if all(p == (0, 0) for p in pads) else jnp.pad(m, pads)


# ----------------------------------- kernels -----------------------------------

def proj_kernel(x_ref, w_ref, p_ref, acc_ref):
    """P[i] = sum_k X[i, k] @ W[k]; f32 accumulation across the K grid axis."""
    @pl.when(pl.program_id(1) == 0)
    def _():
        acc_ref[...] = jnp.zeros_like(acc_ref)

    acc_ref[...] += jnp.dot(x_ref[...], w_ref[...],
                            preferred_element_type=jnp.float32)

    @pl.when(pl.program_id(1) == pl.num_programs(1) - 1)
    def _():
        p_ref[...] = acc_ref[...].astype(p_ref.dtype)


def agg1_relu_proj2_kernel(a_ref, p1_ref, b1_ref, w2_ref, p2_ref):
    """Row block: H = ReLU(A[i,:] @ P1 + b1); P2[i] = H @ W2."""
    h = jnp.dot(a_ref[...], p1_ref[...], preferred_element_type=jnp.float32)
    h = jnp.maximum(h + b1_ref[...], 0.0)
    # TODO(synk): F.dropout(p=0.5, training=True) is not reproduced; eval mode is identity.
    p2_ref[...] = jnp.dot(h.astype(jnp.bfloat16), w2_ref[...],
                          preferred_element_type=jnp.float32).astype(p2_ref.dtype)


def agg2_logsoftmax_kernel(a_ref, p2_ref, b2_ref, out_ref, *, num_classes):
    """Row block: Z = A[i,:] @ P2 + b2; log_softmax over the real class columns (rest masked)."""
    z = jnp.dot(a_ref[...], p2_ref[...], preferred_element_type=jnp.float32) + b2_ref[...]
    col = jax.lax.broadcasted_iota(jnp.int32, z.shape, 1)
    valid = col < num_classes
    z = jnp.where(valid, z, -jnp.inf)
    m = jnp.max(z, axis=1, keepdims=True)
    s = z - m
    lse = jnp.log(jnp.sum(jnp.where(valid, jnp.exp(s), 0.0), axis=1, keepdims=True))
    out_ref[...] = jnp.where(valid, s - lse, 0.0)


# ----------------------------------- wrapper -----------------------------------

def gcn_forward(x, a_norm, w1, b1, w2, b2, *, tm_target=256, tk_target=256):
    n, f_in = x.shape
    hidden = w1.shape[1]
    num_classes = w2.shape[1]
    hp = _round_up(hidden, 128)       # lane-dense hidden width
    cp = _round_up(num_classes, 128)  # lane-dense class width

    tm = _pick_tile(n, tm_target, 8)        # node-row block (sublane multiple of 8)
    tk = _pick_tile(f_in, tk_target, 128)   # F_in reduction block (lane multiple of 128)

    # bf16 MXU operands (f32 accumulation inside the kernels); biases stay f32.
    x_bf = x.astype(jnp.bfloat16)
    a_bf = a_norm.astype(jnp.bfloat16)
    w1_p = _pad_to(w1, (f_in, hp)).astype(jnp.bfloat16)
    b1_p = _pad_to(b1, (1, hp)).astype(jnp.float32)
    w2_p = _pad_to(w2, (hp, cp)).astype(jnp.bfloat16)
    b2_p = _pad_to(b2, (1, cp)).astype(jnp.float32)

    # --- pass 1: P1 = X @ W1 ------------------------------------------------------------------
    p1 = pl.pallas_call(
        proj_kernel,
        out_shape=jax.ShapeDtypeStruct((n, hp), jnp.bfloat16),
        grid=(n // tm, f_in // tk),
        in_specs=[
            pl.BlockSpec((tm, tk), lambda i, k: (i, k)),
            pl.BlockSpec((tk, hp), lambda i, k: (k, 0)),
        ],
        out_specs=pl.BlockSpec((tm, hp), lambda i, k: (i, 0)),
        scratch_shapes=[pltpu.VMEM((tm, hp), jnp.float32)],
        compiler_params=pltpu.CompilerParams(
            dimension_semantics=("parallel", "arbitrary"),
            vmem_limit_bytes=_VMEM_LIMIT),
        cost_estimate=pl.CostEstimate(
            flops=2 * n * f_in * hp,
            transcendentals=0,
            bytes_accessed=2 * (n * f_in + f_in * hp + n * hp)),
    )(x_bf, w1_p)

    # --- pass 2: H = ReLU(A @ P1 + b1); P2 = H @ W2 ------------------------------------------
    p2 = pl.pallas_call(
        agg1_relu_proj2_kernel,
        out_shape=jax.ShapeDtypeStruct((n, cp), jnp.bfloat16),
        grid=(n // tm,),
        in_specs=[
            pl.BlockSpec((tm, n), lambda i: (i, 0)),   # A row block (full N in lanes)
            pl.BlockSpec((n, hp), lambda i: (0, 0)),   # full projected P1
            pl.BlockSpec((1, hp), lambda i: (0, 0)),
            pl.BlockSpec((hp, cp), lambda i: (0, 0)),
        ],
        out_specs=pl.BlockSpec((tm, cp), lambda i: (i, 0)),
        compiler_params=pltpu.CompilerParams(
            dimension_semantics=("parallel",),
            vmem_limit_bytes=_VMEM_LIMIT),
        cost_estimate=pl.CostEstimate(
            flops=2 * n * n * hp + 2 * n * hp * cp,
            transcendentals=0,
            bytes_accessed=2 * (n * n + n * hp + hp * cp + n * cp)),
    )(a_bf, p1, b1_p, w2_p)

    # --- pass 3: Z = A @ P2 + b2; out = log_softmax(Z) (lane-dense [n, cp] slab) ---------------
    out_padded = pl.pallas_call(
        functools.partial(agg2_logsoftmax_kernel, num_classes=num_classes),
        out_shape=jax.ShapeDtypeStruct((n, cp), jnp.float32),
        grid=(n // tm,),
        in_specs=[
            pl.BlockSpec((tm, n), lambda i: (i, 0)),
            pl.BlockSpec((n, cp), lambda i: (0, 0)),
            pl.BlockSpec((1, cp), lambda i: (0, 0)),
        ],
        out_specs=pl.BlockSpec((tm, cp), lambda i: (i, 0)),
        compiler_params=pltpu.CompilerParams(
            dimension_semantics=("parallel",),
            vmem_limit_bytes=_VMEM_LIMIT),
        cost_estimate=pl.CostEstimate(
            flops=2 * n * n * cp,
            transcendentals=n * num_classes,
            bytes_accessed=2 * (n * n + n * cp) + 4 * n * cp),
    )(a_bf, p2, b2_p)

    return out_padded[:, :num_classes]


# ------------------------------ graph / parameter setup ------------------------------

def build_normalized_adjacency(edge_index, num_nodes):
    """Dense D^-1/2 (A + I) D^-1/2 from a [2, E] edge_index (src row 0, dst row 1).

    Matches torch_geometric gcn_norm semantics: per-edge weights scatter-ADD (duplicate edges
    accumulate) and self-loops are added only to nodes that do not already have one.
    """
    src, dst = edge_index[0], edge_index[1]
    a = jnp.zeros((num_nodes, num_nodes), jnp.float32)
    a = a.at[dst, src].add(1.0)  # message j -> i lands in row i
    diag = jnp.diagonal(a)
    a = a + jnp.diag(jnp.where(diag == 0.0, 1.0, 0.0))  # add self-loops only where missing
    deg = jnp.sum(a, axis=1)
    d_inv_sqrt = jnp.where(deg > 0.0, 1.0 / jnp.sqrt(deg), 0.0)
    return d_inv_sqrt[:, None] * a * d_inv_sqrt[None, :]


def glorot(key, fan_in, fan_out):
    limit = (6.0 / (fan_in + fan_out)) ** 0.5
    return jax.random.uniform(key, (fan_in, fan_out), jnp.float32, -limit, limit)


def gcn_reference(x, a, w1, b1, w2, b2):
    h = jnp.maximum(a @ (x @ w1) + b1, 0.0)
    z = a @ (h @ w2) + b2
    return jax.nn.log_softmax(z, axis=1)


if __name__ == "__main__":
    # Small shapes consistent with GCN(init_feature_dim, hidden_channels, num_classes),
    # chosen so the row-block and K-block grids are actually exercised (2 x 2 / 2 / 2 steps).
    N, F_IN, HIDDEN, NUM_CLASSES, NUM_EDGES = 512, 512, 32, 8, 1024

    key = jax.random.PRNGKey(0)
    k_x, k_src, k_dst, k_w1, k_w2 = jax.random.split(key, 5)

    # Node features
    x = jax.random.normal(k_x, (N, F_IN), jnp.float32)

    # Deterministic random undirected graph (COO edge_index [2, 2E], both directions)
    src = jax.random.randint(k_src, (NUM_EDGES,), 0, N)
    dst = jax.random.randint(k_dst, (NUM_EDGES,), 0, N)
    edge_index = jnp.stack(
        [jnp.concatenate([src, dst]), jnp.concatenate([dst, src])], axis=0)
    a_norm = build_normalized_adjacency(edge_index, N)

    # GCNConv parameters: glorot weight, zero bias
    w1 = glorot(k_w1, F_IN, HIDDEN)
    b1 = jnp.zeros((1, HIDDEN), jnp.float32)
    w2 = glorot(k_w2, HIDDEN, NUM_CLASSES)
    b2 = jnp.zeros((1, NUM_CLASSES), jnp.float32)

    out = gcn_forward(x, a_norm, w1, b1, w2, b2)
    jax.block_until_ready(out)

    assert out.shape == (N, NUM_CLASSES)
    # log_softmax rows must sum (in prob space) to 1
    assert bool(jnp.allclose(jnp.sum(jnp.exp(out), axis=1), 1.0, atol=1e-4))
    # bf16-MXU / f32-accumulate kernel vs f32 reference (loose tolerance for bf16 operands)
    ref = gcn_reference(x, a_norm, w1, b1, w2, b2)
    max_err = float(jnp.max(jnp.abs(out - ref)))
    assert max_err < 0.2, max_err
    print("KERNEL_OK")
</pallas_src>

<mosaic_0001>
module attributes {stable_mosaic.version = 11 : i64} {
  func.func @proj_kernel(%arg0: i32, %arg1: i32, %arg2: memref<256x256xbf16, #tpu.memory_space<vmem>>, %arg3: memref<256x128xbf16, #tpu.memory_space<vmem>>, %arg4: memref<256x128xbf16, #tpu.memory_space<vmem>>, %arg5: memref<256x128xf32, #tpu.memory_space<vmem>>) attributes {dimension_semantics = [#tpu.dimension_semantics<parallel>, #tpu.dimension_semantics<arbitrary>], iteration_bounds = array<i64: 2, 2>, scalar_prefetch = 0 : i64, scratch_operands = 1 : i64, tpu.core_type = #tpu.core_type<tc>, window_params = [{transform_indices = @transform_0, window_bounds = array<i64: 256, 256>}, {transform_indices = @transform_1, window_bounds = array<i64: 256, 128>}, {transform_indices = @transform_2, window_bounds = array<i64: 256, 128>}]} {
    %c0_i32 = arith.constant 0 : i32
    %0 = arith.cmpi eq, %arg1, %c0_i32 : i32
    %1 = arith.extui %0 : i1 to i32
    %c0_i32_0 = arith.constant 0 : i32
    %2 = arith.cmpi ne, %1, %c0_i32_0 : i32
    scf.if %2 {
      %cst_9 = arith.constant 0.000000e+00 : f32
      %12 = vector.broadcast %cst_9 : f32 to vector<256x128xf32>
      %c0_10 = arith.constant 0 : index
      %c0_11 = arith.constant 0 : index
      %13 = vector.load %arg5[%c0_10, %c0_11] : memref<256x128xf32, #tpu.memory_space<vmem>>, vector<256x128xf32>
      tpu.vector_store %arg5[%c0_10, %c0_11], %12 {strides = array<i32>} : memref<256x128xf32, #tpu.memory_space<vmem>>, vector<256x128xf32>,
    } else {
    }
    %c0 = arith.constant 0 : index
    %c0_1 = arith.constant 0 : index
    %3 = vector.load %arg5[%c0, %c0_1] : memref<256x128xf32, #tpu.memory_space<vmem>>, vector<256x128xf32>
    %c0_2 = arith.constant 0 : index
    %c0_3 = arith.constant 0 : index
    %4 = vector.load %arg2[%c0_2, %c0_3] : memref<256x256xbf16, #tpu.memory_space<vmem>>, vector<256x256xbf16>
    %c0_4 = arith.constant 0 : index
    %c0_5 = arith.constant 0 : index
    %5 = vector.load %arg3[%c0_4, %c0_5] : memref<256x128xbf16, #tpu.memory_space<vmem>>, vector<256x128xbf16>
    %cst = arith.constant dense<0.000000e+00> : vector<256x128xf32>
    %6 = tpu.matmul %4, %5, %cst {dimension_numbers = #tpu.dot_dimension_numbers<[1], [0], [0], [1], [0, 0, 1, 1], [], []>} : vector<256x256xbf16>, vector<256x128xbf16>, vector<256x128xf32> -> vector<256x128xf32>
    %7 = arith.addf %3, %6 : vector<256x128xf32>
    %c0_6 = arith.constant 0 : index
    %c0_7 = arith.constant 0 : index
    %8 = vector.load %arg5[%c0_6, %c0_7] : memref<256x128xf32, #tpu.memory_space<vmem>>, vector<256x128xf32>
    tpu.vector_store %arg5[%c0_6, %c0_7], %7 {strides = array<i32>} : memref<256x128xf32, #tpu.memory_space<vmem>>, vector<256x128xf32>,
    %c1_i32 = arith.constant 1 : i32
    %9 = arith.cmpi eq, %arg1, %c1_i32 : i32
    %10 = arith.extui %9 : i1 to i32
    %c0_i32_8 = arith.constant 0 : i32
    %11 = arith.cmpi ne, %10, %c0_i32_8 : i32
    scf.if %11 {
      %c0_9 = arith.constant 0 : index
      %c0_10 = arith.constant 0 : index
      %12 = vector.load %arg5[%c0_9, %c0_10] : memref<256x128xf32, #tpu.memory_space<vmem>>, vector<256x128xf32>
      %13 = arith.truncf %12 : vector<256x128xf32> to vector<256x128xbf16>
      %c0_11 = arith.constant 0 : index
      %c0_12 = arith.constant 0 : index
      %14 = vector.load %arg4[%c0_11, %c0_12] : memref<256x128xbf16, #tpu.memory_space<vmem>>, vector<256x128xbf16>
      tpu.vector_store %arg4[%c0_11, %c0_12], %13 {strides = array<i32>} : memref<256x128xbf16, #tpu.memory_space<vmem>>, vector<256x128xbf16>,
    } else {
    }
    return
  }
  func.func @transform_0(%arg0: i32, %arg1: i32) -> (i32, i32) {
    %c0_i32 = arith.constant 0 : i32
    return %arg0, %arg1 : i32, i32
  }
  func.func @transform_1(%arg0: i32, %arg1: i32) -> (i32, i32) {
    %c0_i32 = arith.constant 0 : i32
    %c0_i32_0 = arith.constant 0 : i32
    return %arg1, %c0_i32 : i32, i32
  }
  func.func @transform_2(%arg0: i32, %arg1: i32) -> (i32, i32) {
    %c0_i32 = arith.constant 0 : i32
    %c0_i32_0 = arith.constant 0 : i32
    return %arg0, %c0_i32 : i32, i32
  }
}

</mosaic_0001>

<bundles_post_ra>
// kernel: tpu_custom_call.1
= control target key start
LH: loop header
LB: loop body
LE: loop exit
PB: predicated region body
PF: predicated region fallthrough
CT: control target
= control target key end

     0   :  { %s2191_s0 = inlined_call_operand.hbm [shape: bf16[512,512], index: 0, kind: input, shape index: {}]   ;;  %s2192_s1 = inlined_call_operand.hbm [shape: bf16[512,128], index: 1, kind: input, shape index: {}]   ;;  %s2193_s2 = inlined_call_operand.hbm [shape: bf16[512,128], index: 2, kind: output, shape index: {}]  }
   0x1   :  { %2200 = sst [smem:[#allocation18_spill]] %s2191_s0 }
   0x2   :  { %2201 = sst [smem:[#allocation19_spill]] %s2193_s2 }
   0x3   :  { %7 = vsyncpa [#allocation4], 0 }
   0x4   :  { %9 = vsyncpa [#allocation4 + $0x1], 0 }
   0x5   :  { %10 = vsyncpa [#allocation7], 0 }
   0x6   :  { %12 = vsyncpa [#allocation7 + $0x1], 0 }
   0x7   :  { %13 = vsyncpa [#allocation5], 0 }
   0x8   :  { %15 = vsyncpa [#allocation5 + $0x1], 0  ;;  %s1834_s9 = smov 0   ;;  %s1836_s10 = smov 0  }
   0x9   :  { %s1838_s11 = smov 0   ;;  %s1840_s12 = smov 0  }
   0xa   :  { %s1842_s13 = smov 0   ;;  %s1844_s14 = smov 0  }
   0xb   :  { %s1846_s15 = smov 0   ;;  %s1848_s16 = smov 0  }
   0xc   :  { %s1850_s17 = smov 0   ;;  %s1852_s18 = smov 0  }
   0xd   :  { %s1854_s19 = smov 0   ;;  %s1856_s20 = smov 0  }
   0xe   :  { %s1858_s21 = smov 0   ;;  %s1860_s22 = smov 0  }
   0xf LB: > { %2202 = sst [smem:[#allocation12_spill]] %s1793_s18  ;;  %s30_s23 = sadd.s32 1, %s1801_s20  ;;  %s1809_s22 = sphi %s1860_s22, %s21_s22   ;;  %s1805_s21 = sphi %s1858_s21, %s2225_s21   ;;  %s1801_s20 = sphi %s1856_s20, %s2224_s20   ;;  %s1797_s19 = sphi %s1854_s19, %s2223_s19   ;;  %s1793_s18 = sphi %s1852_s18, %s2222_s18   ;;  %s1789_s17 = sphi %s1850_s17, %s2234_s17   ;;  %s1785_s16 = sphi %s1848_s16, %s2233_s16   ;;  %s1781_s15 = sphi %s1846_s15, %s2232_s15   ;;  %s1777_s14 = sphi %s1844_s14, %s2231_s14   ;;  %s1773_s13 = sphi %s1842_s13, %s2230_s13   ;;  %s1769_s12 = sphi %s1840_s12, %s2229_s12   ;;  %s1765_s11 = sphi %s1838_s11, %s2228_s11   ;;  %s1761_s10 = sphi %s1836_s10, %s2227_s10   ;;  %s1757_s9 = sphi %s1834_s9, %s2226_s9  }
  0x10   : > { %2203 = sst [smem:[#allocation13_spill]] %s1797_s19  ;;  %s33_s24 = sadd.s32 1, %s1805_s21 }
  0x11   : > { %2204 = sst [smem:[#allocation14_spill]] %s1801_s20  ;;  %p31_p0 = scmp.ge.s32.totalorder %s30_s23, 2 }
  0x12   : > { %2205 = sst [smem:[#allocation15_spill]] %s1805_s21  ;;  %s42_s25 = sadd.s32 1, %s1789_s17 }
  0x13   : > { %p49_p1 = scmp.ne.s32.totalorder %s1789_s17, %s1785_s16  ;;  %p50_p2 = scmp.eq.s32.totalorder %s1809_s22, 0 }
  0x14   : > { %s2236_s23 = smov (%p31_p0, %s30_s23), 0  ;;  %s2238_s24 = smov (!%p31_p0, %s33_s24), %s1805_s21 }
  0x15   : > { %2206 = sst [smem:[#allocation16_spill]] %s2236_s23  ;;  %s1915_s26 = ssub.s32 %s1801_s20, %s2236_s23 }
  0x16   : > { %p1919_p3 = por %p50_p2, %p49_p1  ;;  %p35_p4 = scmp.ge.s32.totalorder %s2238_s24, 2 }
  0x17   : > { %p55_p5 = scmp.ne.s32.totalorder %s1785_s16, %s1781_s15  ;;  %s94_s28 = sadd.s32 1, %s1765_s11 }
  0x18   : > { %s2240_s24 = smov (%p35_p4, %s2238_s24), 0  ;;  %p2196_p6 = scmp.lt.s32.totalorder %s1809_s22, 4 }
  0x19   : > { %2208 = sst [smem:[#allocation17_spill]] %s2240_s24  ;;  %s131_s29 = sand.u32 1, %s1789_s17  }
  0x1a   : > { %s37_s30 = ssub.s32 %s1805_s21, %s2240_s24  ;;  %s1087_s4 = sshll.u32 %s131_s29, 8 }
  0x1b   : > { %s39_s3 = sor.u32 %s1915_s26, %s37_s30  ;;  %p92_p7 = scmp.eq.s32.totalorder %s37_s30, 0 }
  0x1c   : > { %p40_p8 = scmp.eq.s32.totalorder %s39_s3, 0  ;;  %s1089_s7 = sshll.u32 %s1801_s20, 1 }
  0x1d   : > { %s1934_s5 = scalar_select %p92_p7, %s1765_s11, %s94_s28  }
  0x1e   : > { %s1937_s6 = scalar_select %p40_p8, %s1789_s17, %s42_s25  }
  0x1f   : > { %s1298_s8 = sshll.u32 %s1805_s21, 7  ;;  %s135_s23 = scalar_lea.vmem [#allocation3], %s1087_s4 }
  0x20   : > { %s146_s2 = sshll.u32 %s135_s23, 4  ;;  %s141_s19 = sadd.s32 %s1298_s8, %s1089_s7  ;;  %s147_s2 = int_to_ptr.vmem [resolvable:$true] %s146_s2 }
  0x21   : > { %s1091_s18 = sshll.u32 %s141_s19, 2  ;;  %p1467_p9 = pnand %p2196_p6, %p1919_p3 }
  0x22   : > { %s2209_s0 = sld [smem:[#allocation18_spill]]  ;;  %p1095_p10 = scmp.ge.s32.totalorder %s1809_s22, 1 }
  0x23   : > { %s132_s19 = scalar_lea.sflag [#allocation4], %s131_s29  ;;  %s1811_s23 = smov 256  }
  0x24   : > { %s1812_s27 = smov 128   ;;  %s1813_s4 = smov 8  }
  0x25   : > { %p176_p11 = scmp.lt.s32.totalorder %s1809_s22, 5  ;;  %s1083_s7 = sadd.s32 4294967295, %s1809_s22  }
  0x26   : > { %s1084_s8 = sadd.s32 4294967294, %s1809_s22   ;;  %p56_p13 = scmp.eq.s32.totalorder %s1083_s7, 0 }
  0x27   : > { %p1950_p12 = pnand %p1095_p10, %p176_p11  ;;  %p66_p0 = scmp.eq.s32.totalorder %s1915_s26, 0 }
  0x28   : > { %s143_s25 = scalar_lea.hbm %s2209_s0, %s1091_s18  ;;  %s68_s29 = sadd.s32 1, %s1777_s14 }
  0x29   : > { %s144_s28 = sshll.u32 %s143_s25, 4  ;;  %p75_p1 = scmp.ne.s32.totalorder %s1777_s14, %s1773_s13  ;;  %s145_s28 = int_to_ptr.hbm [resolvable:$true] %s144_s28 }
  0x2a   : > { %1469 = dma.hbm_to_vmem [thread:$0]  (!%p1467_p9), %s145_s28, 4096, %s147_s2, %s132_s19, %s1811_s23, %s1812_s27, %s1813_s4  }
  0x2b   : > { %p1963_p3 = por %p56_p13, %p55_p5  ;;  %p81_p4 = scmp.ne.s32.totalorder %s1773_s13, %s1769_s12 }
  0x2c   : > { %s1970_s2 = scalar_select %p66_p0, %s1777_s14, %s68_s29  }
  0x2d   : > { %p1974_p7 = por %p75_p1, %p50_p2  ;;  %p1978_p8 = por %p81_p4, %p56_p13 }
  0x2e   : > { %p104_p9 = scmp.ne.s32.totalorder %s1765_s11, %s1761_s10  ;;  %p105_p10 = scmp.eq.s32.totalorder %s1083_s7, 3 }
  0x2f   : > { %p110_p5 = scmp.ne.s32.totalorder %s1761_s10, %s1757_s9  ;;  %p111_p11 = scmp.eq.s32.totalorder %s1084_s8, 3 }
  0x30   : > { %p1986_p6 = por %p105_p10, %p104_p9  ;;  %s156_s12 = sand.u32 1, %s1777_s14  }
  0x31   : > { %p1991_p0 = por %p111_p11, %p110_p5  ;;  %s1092_s28 = sshll.u32 %s156_s12, 7 }
  0x32   : > { %s1299_s19 = sshll.u32 %s1801_s20, 7  ;;  %s160_s0 = scalar_lea.vmem [#allocation6], %s1092_s28 }
  0x33   : > { %s165_s4 = scalar_lea.hbm %s2192_s1, %s1299_s19  ;;  %s168_s7 = sshll.u32 %s160_s0, 4  ;;  %s169_s7 = int_to_ptr.vmem [resolvable:$true] %s168_s7 }
  0x34   : > { %s166_s29 = sshll.u32 %s165_s4, 4  ;;  %p2216_p2 = scmp.lt.s32.totalorder %s1809_s22, 4  ;;  %s167_s29 = int_to_ptr.hbm [resolvable:$true] %s166_s29 }
  0x35   : > { %s157_s8 = scalar_lea.sflag [#allocation7], %s156_s12  ;;  %s1814_s24 = smov 64  }
  0x36   : > { %p1470_p13 = pnand %p2216_p2, %p1974_p7  ;;  %s1815_s21 = smov 4  }
  0x37   : > { %180 = sbr.rel (%p1950_p12) target bundleno = 442 (0x1ba), region = 28  ;;  %s182_s20 = sand.u32 (!%p1950_p12), 1, %s1785_s16  }
  0x38   : > { %1472 = dma.hbm_to_vmem [thread:$0]  (!%p1470_p13), %s167_s29, 2048, %s169_s7, %s157_s8, %s1814_s24, %s1814_s24, %s1815_s21  }
  0x39   : > { %s1096_s23 = sshll.u32 (!%p1950_p12), %s182_s20, 8  ;;  %s183_s19 = scalar_lea.sflag (!%p1950_p12), [#allocation4], %s182_s20 }
  0x3a   : > { %s2006_s27 = scalar_lea.vmem (!%p1950_p12), [#allocation3], %s1096_s23 }
  0x3c   : > { %1744 = dma.done.wait (%p1963_p3), %s183_s19, 4096  }
  0x3d   : > { %1746 = vsyncadd (%p1963_p3), %s183_s19, 4294963200  ;;  %s192_s0 = sand.u32 1, %s1773_s13  }
  0x3e   : > { %s1097_s3 = sshll.u32 %s192_s0, 7  ;;  %s193_s21 = scalar_lea.sflag [#allocation7], %s192_s0 }
  0x3f   : > { %s2013_s24 = scalar_lea.vmem [#allocation6], %s1097_s3 }
  0x40   : > { %1748 = dma.done.wait (%p1978_p8), %s193_s21, 2048  }
  0x41   : > { %1750 = vsyncadd (%p1978_p8), %s193_s21, 4294965248  ;;  %s220_s20 = sand.u32 1, %s1761_s10   ;;  %s2217_s30 = sld [smem:[#allocation12_spill]] }
  0x42   : > { %s1098_s18 = sshll.u32 %s220_s20, 7 }
  0x43   : > { %s2022_s12 = scalar_lea.vmem [#allocation8], %s1098_s18 }
  0x47   : > { %p1099_p12 = scmp.ne.s32.totalorder %s2217_s30, 0 }
  0x49   : > { %230 = sbr.rel (%p1099_p12) target bundleno = 111 (0x6f), region = 40 }
  0x4e   : > { %v1816_v0 = vmov 0.0  }
  0x4f   : > { %231 = vst [vmem:[#allocation2 + $0xb0] sm:$0xff] %v1816_v0 }
  0x50   : > { %232 = vst [vmem:[#allocation2] sm:$0xff] %v1816_v0 }
  0x51   : > { %233 = vst [vmem:[#allocation2 + $0xd8] sm:$0xff] %v1816_v0 }
  0x52   : > { %234 = vst [vmem:[#allocation2 + $0x18] sm:$0xff] %v1816_v0 }
  0x53   : > { %235 = vst [vmem:[#allocation2 + $0x50] sm:$0xff] %v1816_v0 }
  0x54   : > { %236 = vst [vmem:[#allocation2 + $0x68] sm:$0xff] %v1816_v0 }
  0x55   : > { %237 = vst [vmem:[#allocation2 + $0x30] sm:$0xff] %v1816_v0 }
  0x56   : > { %238 = vst [vmem:[#allocation2 + $0x48] sm:$0xff] %v1816_v0 }
  0x57   : > { %239 = vst [vmem:[#allocation2 + $0x80] sm:$0xff] %v1816_v0 }
  0x58   : > { %240 = vst [vmem:[#allocation2 + $0x88] sm:$0xff] %v1816_v0 }
  0x59   : > { %241 = vst [vmem:[#allocation2 + $0xe8] sm:$0xff] %v1816_v0 }
  0x5a   : > { %242 = vst [vmem:[#allocation2 + $0xb8] sm:$0xff] %v1816_v0 }
  0x5b   : > { %243 = vst [vmem:[#allocation2 + $0x60] sm:$0xff] %v1816_v0 }
  0x5c   : > { %244 = vst [vmem:[#allocation2 + $0xf0] sm:$0xff] %v1816_v0 }
  0x5d   : > { %245 = vst [vmem:[#allocation2 + $0x8] sm:$0xff] %v1816_v0 }
  0x5e   : > { %246 = vst [vmem:[#allocation2 + $0x78] sm:$0xff] %v1816_v0 }
  0x5f   : > { %247 = vst [vmem:[#allocation2 + $0x38] sm:$0xff] %v1816_v0 }
  0x60   : > { %248 = vst [vmem:[#allocation2 + $0x58] sm:$0xff] %v1816_v0 }
  0x61   : > { %249 = vst [vmem:[#allocation2 + $0x40] sm:$0xff] %v1816_v0 }
  0x62   : > { %250 = vst [vmem:[#allocation2 + $0xc8] sm:$0xff] %v1816_v0 }
  0x63   : > { %251 = vst [vmem:[#allocation2 + $0xe0] sm:$0xff] %v1816_v0 }
  0x64   : > { %252 = vst [vmem:[#allocation2 + $0x90] sm:$0xff] %v1816_v0 }
  0x65   : > { %253 = vst [vmem:[#allocation2 + $0x70] sm:$0xff] %v1816_v0 }
  0x66   : > { %254 = vst [vmem:[#allocation2 + $0xc0] sm:$0xff] %v1816_v0 }
  0x67   : > { %255 = vst [vmem:[#allocation2 + $0xa8] sm:$0xff] %v1816_v0 }
  0x68   : > { %256 = vst [vmem:[#allocation2 + $0xd0] sm:$0xff] %v1816_v0 }
  0x69   : > { %257 = vst [vmem:[#allocation2 + $0x10] sm:$0xff] %v1816_v0 }
  0x6a   : > { %258 = vst [vmem:[#allocation2 + $0x28] sm:$0xff] %v1816_v0 }
  0x6b   : > { %259 = vst [vmem:[#allocation2 + $0xa0] sm:$0xff] %v1816_v0 }
  0x6c   : > { %260 = vst [vmem:[#allocation2 + $0xf8] sm:$0xff] %v1816_v0 }
  0x6d   : > { %261 = vst [vmem:[#allocation2 + $0x20] sm:$0xff] %v1816_v0 }
  0x6e   : > { %262 = vst [vmem:[#allocation2 + $0x98] sm:$0xff] %v1816_v0 }
  0x6f PF: > { %v1339_v1 = vld [vmem:[%s2013_s24 + $0x38] sm:$0xff]  ;;  %v1338_v3 = vld [vmem:[%s2013_s24 + $0x30] sm:$0xff]  ;;  %v1337_v5 = vld [vmem:[%s2013_s24 + $0x28] sm:$0xff]  ;;  %s2218_s25 = sld [smem:[#allocation12_spill]] }
  0x70   : > { %v1347_v2 = vld [vmem:[%s2013_s24 + $0x78] sm:$0xff]  ;;  %615 = vmatpush.bf16.msra.mxu0 %v1339_v1  ;;  %1444 = vmatpush.bf16.msra.mxu2 %v1339_v1  ;;  %v1346_v4 = vld [vmem:[%s2013_s24 + $0x70] sm:$0xff]  ;;  %v1345_v6 = vld [vmem:[%s2013_s24 + $0x68] sm:$0xff] }
  0x71   : > { %704 = vmatpush.bf16.msra.mxu1 %v1347_v2  ;;  %1452 = vmatpush.bf16.msra.mxu3 %v1347_v2  ;;  %v1336_v7 = vld [vmem:[%s2013_s24 + $0x20] sm:$0xff]  ;;  %v1335_v9 = vld [vmem:[%s2013_s24 + $0x18] sm:$0xff]  ;;  %v1334_v11 = vld [vmem:[%s2013_s24 + $0x10] sm:$0xff] }
  0x72   : > { %v1344_v8 = vld [vmem:[%s2013_s24 + $0x60] sm:$0xff]  ;;  %v1343_v10 = vld [vmem:[%s2013_s24 + $0x58] sm:$0xff]  ;;  %v1342_v12 = vld [vmem:[%s2013_s24 + $0x50] sm:$0xff] }
  0x73   : > { %v1333_v13 = vld [vmem:[%s2013_s24 + $0x8] sm:$0xff]  ;;  %v1332_v15 = vld [vmem:[%s2013_s24] sm:$0xff]  ;;  %v1110_v29 = vld [vmem:[%s2006_s27 + $0x10] sm:$0xf] }
  0x74   : > { %616 = vmatpush.bf16.msra.mxu0 %v1338_v3  ;;  %1445 = vmatpush.bf16.msra.mxu2 %v1338_v3  ;;  %v1341_v14 = vld [vmem:[%s2013_s24 + $0x48] sm:$0xff]  ;;  %v1340_v16 = vld [vmem:[%s2013_s24 + $0x40] sm:$0xff]  ;;  %v1303_v30 = vld [vmem:[%s2006_s27 + $0x14] sm:$0xf0] }
  0x75   : > { %705 = vmatpush.bf16.msra.mxu1 %v1346_v4  ;;  %1453 = vmatpush.bf16.msra.mxu3 %v1346_v4  ;;  %v1102_v17 = vld [vmem:[%s2006_s27] sm:$0xf]  ;;  %v1301_v18 = vld [vmem:[%s2006_s27 + $0x4] sm:$0xf0]  ;;  %v1300_v21 = vld [vmem:[%s2006_s27 + $0x4] sm:$0xf]  ;;  %v1111_v37 = vor.u32 %v1303_v30, %v1110_v29 }
  0x76   : > { %v1166_v19 = vld [vmem:[%s2006_s27 + $0x80] sm:$0xf]  ;;  %v1317_v20 = vld [vmem:[%s2006_s27 + $0x84] sm:$0xf0]  ;;  %v1104_v22 = vld [vmem:[%s2006_s27 + $0x8] sm:$0xf0]  ;;  %v1103_v25 = vor.u32 %v1301_v18, %v1102_v17 }
  0x77   : > { %v1316_v23 = vld [vmem:[%s2006_s27 + $0x84] sm:$0xf]  ;;  %v1168_v24 = vld [vmem:[%s2006_s27 + $0x88] sm:$0xf0]  ;;  %v1167_v26 = vor.u32 %v1317_v20, %v1166_v19  ;;  %v1107_v27 = vor.u32 %v1300_v21, %v1104_v22  ;;  %v1174_v31 = vld [vmem:[%s2006_s27 + $0x90] sm:$0xf] }
  0x78   : > { %617 = vmatpush.bf16.msra.mxu0 %v1337_v5  ;;  %1446 = vmatpush.bf16.msra.mxu2 %v1337_v5  ;;  %v1171_v28 = vor.u32 %v1316_v23, %v1168_v24  ;;  %v1319_v32 = vld [vmem:[%s2006_s27 + $0x94] sm:$0xf0]  ;;  %v1302_v33 = vld [vmem:[%s2006_s27 + $0x14] sm:$0xf]  ;;  %v1112_v34 = vld [vmem:[%s2006_s27 + $0x18] sm:$0xf0] }
  0x79   : > { %706 = vmatpush.bf16.msra.mxu1 %v1345_v6  ;;  %1454 = vmatpush.bf16.msra.mxu3 %v1345_v6  ;;  %v1318_v35 = vld [vmem:[%s2006_s27 + $0x94] sm:$0xf]  ;;  %v1176_v36 = vld [vmem:[%s2006_s27 + $0x98] sm:$0xf0]  ;;  %v1175_v38 = vor.u32 %v1319_v32, %v1174_v31  ;;  %v1115_v39 = vor.u32 %v1302_v33, %v1112_v34  ;;  %v1118_v41 = vld [vmem:[%s2006_s27 + $0x20] sm:$0xf] }
  0x7a   : > { %v1179_v40 = vor.u32 %v1318_v35, %v1176_v36  ;;  %v1305_v42 = vld [vmem:[%s2006_s27 + $0x24] sm:$0xf0]  ;;  %v1182_v43 = vld [vmem:[%s2006_s27 + $0xa0] sm:$0xf]  ;;  %v1304_v45 = vld [vmem:[%s2006_s27 + $0x24] sm:$0xf] }
  0x7b   : > { %v1321_v44 = vld [vmem:[%s2006_s27 + $0xa4] sm:$0xf0]  ;;  %v1120_v46 = vld [vmem:[%s2006_s27 + $0x28] sm:$0xf0]  ;;  %v1320_v47 = vld [vmem:[%s2006_s27 + $0xa4] sm:$0xf]  ;;  %v1119_v49 = vor.u32 %v1305_v42, %v1118_v41 }
  0x7c   : > { %618 = vmatpush.bf16.msra.mxu0 %v1336_v7  ;;  %1447 = vmatpush.bf16.msra.mxu2 %v1336_v7  ;;  %v1184_v48 = vld [vmem:[%s2006_s27 + $0xa8] sm:$0xf0]  ;;  %v1183_v50 = vor.u32 %v1321_v44, %v1182_v43  ;;  %v1123_v51 = vor.u32 %v1304_v45, %v1120_v46  ;;  %v1126_v53 = vld [vmem:[%s2006_s27 + $0x30] sm:$0xf]  ;;  %v1307_v54 = vld [vmem:[%s2006_s27 + $0x34] sm:$0xf0] }
  0x7d   : > { %707 = vmatpush.bf16.msra.mxu1 %v1344_v8  ;;  %1455 = vmatpush.bf16.msra.mxu3 %v1344_v8  ;;  %v1187_v52 = vor.u32 %v1320_v47, %v1184_v48  ;;  %v1190_v55 = vld [vmem:[%s2006_s27 + $0xb0] sm:$0xf]  ;;  %v1323_v56 = vld [vmem:[%s2006_s27 + $0xb4] sm:$0xf0]  ;;  %v1306_v57 = vld [vmem:[%s2006_s27 + $0x34] sm:$0xf]  ;;  %v1127_v61 = vor.u32 %v1307_v54, %v1126_v53 }
  0x7e   : > { %v1128_v58 = vld [vmem:[%s2006_s27 + $0x38] sm:$0xf0]  ;;  %v1322_v59 = vld [vmem:[%s2006_s27 + $0xb4] sm:$0xf]  ;;  %v1191_v62 = vor.u32 %v1323_v56, %v1190_v55  ;;  %v1134_v1 = vld [vmem:[%s2006_s27 + $0x40] sm:$0xf] }
  0x7f   : > { %v1192_v60 = vld [vmem:[%s2006_s27 + $0xb8] sm:$0xf0]  ;;  %v1131_v63 = vor.u32 %v1306_v57, %v1128_v58  ;;  %v1309_v2 = vld [vmem:[%s2006_s27 + $0x44] sm:$0xf0]  ;;  %v1198_v3 = vld [vmem:[%s2006_s27 + $0xc0] sm:$0xf] }
  0x80   : > { %619 = vmatpush.bf16.msra.mxu0 %v1335_v9  ;;  %1448 = vmatpush.bf16.msra.mxu2 %v1335_v9  ;;  %v1195_v0 = vor.u32 %v1322_v59, %v1192_v60  ;;  %v1325_v4 = vld [vmem:[%s2006_s27 + $0xc4] sm:$0xf0]  ;;  %v1308_v5 = vld [vmem:[%s2006_s27 + $0x44] sm:$0xf]  ;;  %v1136_v6 = vld [vmem:[%s2006_s27 + $0x48] sm:$0xf0]  ;;  %v1135_v9 = vor.u32 %v1309_v2, %v1134_v1 }
  0x81   : > { %708 = vmatpush.bf16.msra.mxu1 %v1343_v10  ;;  %1456 = vmatpush.bf16.msra.mxu3 %v1343_v10  ;;  %v1324_v7 = vld [vmem:[%s2006_s27 + $0xc4] sm:$0xf]  ;;  %v1200_v8 = vld [vmem:[%s2006_s27 + $0xc8] sm:$0xf0]  ;;  %v1199_v10 = vor.u32 %v1325_v4, %v1198_v3  ;;  %v1310_v17 = vld [vmem:[%s2006_s27 + $0x54] sm:$0xf] }
  0x82   : > { %v1144_v18 = vld [vmem:[%s2006_s27 + $0x58] sm:$0xf0]  ;;  %v1326_v19 = vld [vmem:[%s2006_s27 + $0xd4] sm:$0xf]  ;;  %v1312_v29 = vld [vmem:[%s2006_s27 + $0x64] sm:$0xf] }
  0x83   : > { %v1208_v20 = vld [vmem:[%s2006_s27 + $0xd8] sm:$0xf0]  ;;  %v1147_v23 = vor.u32 %v1310_v17, %v1144_v18  ;;  %v1152_v30 = vld [vmem:[%s2006_s27 + $0x68] sm:$0xf0]  ;;  %v1328_v31 = vld [vmem:[%s2006_s27 + $0xe4] sm:$0xf] }
  0x84   : > { %620 = vmatpush.bf16.msra.mxu0 %v1334_v11  ;;  %1449 = vmatpush.bf16.msra.mxu2 %v1334_v11  ;;  %v1139_v11 = vor.u32 %v1308_v5, %v1136_v6  ;;  %v1211_v24 = vor.u32 %v1326_v19, %v1208_v20  ;;  %v1216_v32 = vld [vmem:[%s2006_s27 + $0xe8] sm:$0xf0]  ;;  %v1155_v35 = vor.u32 %v1312_v29, %v1152_v30  ;;  %v1314_v41 = vld [vmem:[%s2006_s27 + $0x74] sm:$0xf]  ;;  %v1160_v42 = vld [vmem:[%s2006_s27 + $0x78] sm:$0xf0] }
  0x85   : > { %709 = vmatpush.bf16.msra.mxu1 %v1342_v12  ;;  %1457 = vmatpush.bf16.msra.mxu3 %v1342_v12  ;;  %v1203_v12 = vor.u32 %v1324_v7, %v1200_v8  ;;  %v1219_v36 = vor.u32 %v1328_v31, %v1216_v32  ;;  %v1330_v43 = vld [vmem:[%s2006_s27 + $0xf4] sm:$0xf]  ;;  %v1224_v44 = vld [vmem:[%s2006_s27 + $0xf8] sm:$0xf0]  ;;  %v1163_v47 = vor.u32 %v1314_v41, %v1160_v42  ;;  %v264_v59 = vld [vmem:[#allocation2] sm:$0xff]  ;;  %p1292_p1 = scmp.ne.s32.totalorder %s2218_s25, 1 }
  0x86   : > { %v1227_v48 = vor.u32 %v1330_v43, %v1224_v44  ;;  %v279_v55 = vld [vmem:[#allocation2 + $0x38] sm:$0xff]  ;;  %v283_v31 = vld [vmem:[#allocation2 + $0xe0] sm:$0xff]  ;;  %v284_v41 = vld [vmem:[#allocation2 + $0x90] sm:$0xff] }
  0x87   : > { %v280_v1 = vld [vmem:[#allocation2 + $0x58] sm:$0xff] }
  0x88   : > { %621 = vmatpush.bf16.msra.mxu0 %v1333_v13  ;;  %1450 = vmatpush.bf16.msra.mxu2 %v1333_v13  ;;  %v1142_v13 = vld [vmem:[%s2006_s27 + $0x50] sm:$0xf]  ;;  %v265_v5 = vld [vmem:[#allocation2 + $0xd8] sm:$0xff] }
  0x89   : > { %710 = vmatpush.bf16.msra.mxu1 %v1341_v14  ;;  %1458 = vmatpush.bf16.msra.mxu3 %v1341_v14  ;;  %v1311_v14 = vld [vmem:[%s2006_s27 + $0x54] sm:$0xf0] }
  0x8a   : > { %v1143_v21 = vor.u32 %v1311_v14, %v1142_v13 }
  0x8c   : > { %622 = vmatpush.bf16.msra.mxu0 %v1332_v15  ;;  %1451 = vmatpush.bf16.msra.mxu2 %v1332_v15  ;;  %v1206_v15 = vld [vmem:[%s2006_s27 + $0xd0] sm:$0xf] }
  0x8d   : > { %711 = vmatpush.bf16.msra.mxu1 %v1340_v16  ;;  %1459 = vmatpush.bf16.msra.mxu3 %v1340_v16  ;;  %v1327_v16 = vld [vmem:[%s2006_s27 + $0xd4] sm:$0xf0] }
  0x8e   : > { %v1207_v22 = vor.u32 %v1327_v16, %v1206_v15  ;;  %v266_v15 = vld [vmem:[#allocation2 + $0x18] sm:$0xff] }
  0x8f   : > { %623 = vmatmul.bf16.vlgmr.msra.gmra.mxu0 %v1103_v25  ;;  %663 = vmatmul.bf16.vlgmr.msra.gmra.mxu2 %v1167_v26  ;;  %v1150_v25 = vld [vmem:[%s2006_s27 + $0x60] sm:$0xf]  ;;  %v1313_v26 = vld [vmem:[%s2006_s27 + $0x64] sm:$0xf0] }
  0x90   : > { %712 = vmatmul.bf16.vlgmr.msra.gmra.mxu1 %v1107_v27  ;;  %752 = vmatmul.bf16.vlgmr.msra.gmra.mxu3 %v1171_v28  ;;  %v1214_v27 = vld [vmem:[%s2006_s27 + $0xe0] sm:$0xf]  ;;  %v1329_v28 = vld [vmem:[%s2006_s27 + $0xe4] sm:$0xf0]  ;;  %v1151_v33 = vor.u32 %v1313_v26, %v1150_v25  ;;  %v267_v25 = vld [vmem:[#allocation2 + $0x50] sm:$0xff] }
  0x91   : > { %v1215_v34 = vor.u32 %v1329_v28, %v1214_v27 }
  0x9f   : > { %628 = vmatmul.bf16.gmra.mxu0 %v1111_v37  ;;  %668 = vmatmul.bf16.gmra.mxu2 %v1175_v38  ;;  %v1158_v37 = vld [vmem:[%s2006_s27 + $0x70] sm:$0xf]  ;;  %v1315_v38 = vld [vmem:[%s2006_s27 + $0x74] sm:$0xf0] }
  0xa0   : > { %717 = vmatmul.bf16.gmra.mxu1 %v1115_v39  ;;  %757 = vmatmul.bf16.gmra.mxu3 %v1179_v40  ;;  %v1222_v39 = vld [vmem:[%s2006_s27 + $0xf0] sm:$0xf]  ;;  %v1331_v40 = vld [vmem:[%s2006_s27 + $0xf4] sm:$0xf0]  ;;  %v1159_v45 = vor.u32 %v1315_v38, %v1158_v37 }
  0xa1   : > { %v1223_v46 = vor.u32 %v1331_v40, %v1222_v39 }
  0xaf   : > { %633 = vmatmul.bf16.gmra.mxu0 %v1119_v49  ;;  %673 = vmatmul.bf16.gmra.mxu2 %v1183_v50  ;;  %v263_v50 = vld [vmem:[#allocation2 + $0xb0] sm:$0xff] }
  0xb0   : > { %722 = vmatmul.bf16.gmra.mxu1 %v1123_v51  ;;  %762 = vmatmul.bf16.gmra.mxu3 %v1187_v52 }
  0xbf   : > { %638 = vmatmul.bf16.gmra.mxu0 %v1127_v61  ;;  %678 = vmatmul.bf16.gmra.mxu2 %v1191_v62 }
  0xc0   : > { %727 = vmatmul.bf16.gmra.mxu1 %v1131_v63  ;;  %767 = vmatmul.bf16.gmra.mxu3 %v1195_v0 }
  0xcf   : > { %643 = vmatmul.bf16.gmra.mxu0 %v1135_v9  ;;  %683 = vmatmul.bf16.gmra.mxu2 %v1199_v10 }
  0xd0   : > { %732 = vmatmul.bf16.gmra.mxu1 %v1139_v11  ;;  %772 = vmatmul.bf16.gmra.mxu3 %v1203_v12  ;;  %v281_v11 = vld [vmem:[#allocation2 + $0x40] sm:$0xff] }
  0xdf   : > { %648 = vmatmul.bf16.gmra.mxu0 %v1143_v21  ;;  %688 = vmatmul.bf16.gmra.mxu2 %v1207_v22  ;;  %v282_v21 = vld [vmem:[#allocation2 + $0xc8] sm:$0xff] }
  0xe0   : > { %737 = vmatmul.bf16.gmra.mxu1 %v1147_v23  ;;  %777 = vmatmul.bf16.gmra.mxu3 %v1211_v24 }
  0xef   : > { %653 = vmatmul.bf16.gmra.mxu0 %v1151_v33  ;;  %693 = vmatmul.bf16.gmra.mxu2 %v1215_v34 }
  0xf0   : > { %742 = vmatmul.bf16.gmra.mxu1 %v1155_v35  ;;  %782 = vmatmul.bf16.gmra.mxu3 %v1219_v36  ;;  %v268_v35 = vld [vmem:[#allocation2 + $0x68] sm:$0xff] }
  0xff   : > { %658 = vmatmul.bf16.gmra.mxu0 %v1159_v45  ;;  %698 = vmatmul.bf16.gmra.mxu2 %v1223_v46  ;;  %v269_v45 = vld [vmem:[#allocation2 + $0x30] sm:$0xff] }
 0x100   : > { %747 = vmatmul.bf16.gmra.mxu1 %v1163_v47  ;;  %787 = vmatmul.bf16.gmra.mxu3 %v1227_v48 }
 0x10c   : > { %v624_v49 = vpop.f32.mrf.mxu0 }
 0x10d   : > { %v713_v51 = vpop.f32.mrf.mxu1 }
 0x10e   : > { %v714_v52 = vadd.f32 %v713_v51, %v624_v49  ;;  %v285_v51 = vld [vmem:[#allocation2 + $0x70] sm:$0xff] }
 0x110   : > { %v793_v53 = vadd.f32 %v714_v52, %v263_v50 }
 0x112   : > { %825 = vst [vmem:[#allocation2 + $0xb0] sm:$0xff] %v793_v53  ;;  %v664_v54 = vpop.f32.mrf.mxu2 }
 0x113   : > { %v753_v56 = vpop.f32.mrf.mxu3 }
 0x114   : > { %v754_v57 = vadd.f32 %v753_v56, %v664_v54  ;;  %v626_v58 = vpop.f32.mrf.mxu0 }
 0x115   : > { %v715_v60 = vpop.f32.mrf.mxu1 }
 0x116   : > { %v809_v61 = vadd.f32 %v754_v57, %v279_v55  ;;  %v716_v62 = vadd.f32 %v715_v60, %v626_v58  ;;  %v270_v55 = vld [vmem:[#allocation2 + $0x48] sm:$0xff] }
 0x118   : > { %841 = vst [vmem:[#allocation2 + $0x38] sm:$0xff] %v809_v61  ;;  %v794_v63 = vadd.f32 %v716_v62, %v264_v59  ;;  %v286_v61 = vld [vmem:[#allocation2 + $0xc0] sm:$0xff] }
 0x11a   : > { %826 = vst [vmem:[#allocation2] sm:$0xff] %v794_v63  ;;  %v666_v0 = vpop.f32.mrf.mxu2 }
 0x11b   : > { %v755_v2 = vpop.f32.mrf.mxu3 }
 0x11c   : > { %v756_v3 = vadd.f32 %v755_v2, %v666_v0  ;;  %v629_v4 = vpop.f32.mrf.mxu0 }
 0x11d   : > { %v718_v6 = vpop.f32.mrf.mxu1 }
 0x11e   : > { %v810_v7 = vadd.f32 %v756_v3, %v280_v1  ;;  %v719_v8 = vadd.f32 %v718_v6, %v629_v4  ;;  %v271_v1 = vld [vmem:[#allocation2 + $0x80] sm:$0xff] }
 0x120   : > { %842 = vst [vmem:[#allocation2 + $0x58] sm:$0xff] %v810_v7  ;;  %v795_v9 = vadd.f32 %v719_v8, %v265_v5  ;;  %v287_v7 = vld [vmem:[#allocation2 + $0xa8] sm:$0xff] }
 0x122   : > { %827 = vst [vmem:[#allocation2 + $0xd8] sm:$0xff] %v795_v9  ;;  %v669_v10 = vpop.f32.mrf.mxu2 }
 0x123   : > { %v758_v12 = vpop.f32.mrf.mxu3 }
 0x124   : > { %v759_v13 = vadd.f32 %v758_v12, %v669_v10  ;;  %v631_v14 = vpop.f32.mrf.mxu0 }
 0x125   : > { %v720_v16 = vpop.f32.mrf.mxu1 }
 0x126   : > { %v811_v17 = vadd.f32 %v759_v13, %v281_v11  ;;  %v721_v18 = vadd.f32 %v720_v16, %v631_v14  ;;  %v272_v11 = vld [vmem:[#allocation2 + $0x88] sm:$0xff] }
 0x128   : > { %843 = vst [vmem:[#allocation2 + $0x40] sm:$0xff] %v811_v17  ;;  %v796_v19 = vadd.f32 %v721_v18, %v266_v15  ;;  %v288_v17 = vld [vmem:[#allocation2 + $0xd0] sm:$0xff] }
 0x12a   : > { %828 = vst [vmem:[#allocation2 + $0x18] sm:$0xff] %v796_v19  ;;  %v671_v20 = vpop.f32.mrf.mxu2 }
 0x12b   : > { %v760_v22 = vpop.f32.mrf.mxu3 }
 0x12c   : > { %v761_v23 = vadd.f32 %v760_v22, %v671_v20  ;;  %v634_v24 = vpop.f32.mrf.mxu0 }
 0x12d   : > { %v723_v26 = vpop.f32.mrf.mxu1 }
 0x12e   : > { %v812_v27 = vadd.f32 %v761_v23, %v282_v21  ;;  %v724_v28 = vadd.f32 %v723_v26, %v634_v24  ;;  %v273_v21 = vld [vmem:[#allocation2 + $0xe8] sm:$0xff] }
 0x130   : > { %844 = vst [vmem:[#allocation2 + $0xc8] sm:$0xff] %v812_v27  ;;  %v797_v29 = vadd.f32 %v724_v28, %v267_v25  ;;  %v289_v27 = vld [vmem:[#allocation2 + $0x10] sm:$0xff] }
 0x132   : > { %829 = vst [vmem:[#allocation2 + $0x50] sm:$0xff] %v797_v29  ;;  %v674_v30 = vpop.f32.mrf.mxu2 }
 0x133   : > { %v763_v32 = vpop.f32.mrf.mxu3 }
 0x134   : > { %v764_v33 = vadd.f32 %v763_v32, %v674_v30  ;;  %v636_v34 = vpop.f32.mrf.mxu0 }
 0x135   : > { %v725_v36 = vpop.f32.mrf.mxu1 }
 0x136   : > { %v813_v37 = vadd.f32 %v764_v33, %v283_v31  ;;  %v726_v38 = vadd.f32 %v725_v36, %v636_v34  ;;  %v274_v31 = vld [vmem:[#allocation2 + $0xb8] sm:$0xff] }
 0x138   : > { %845 = vst [vmem:[#allocation2 + $0xe0] sm:$0xff] %v813_v37  ;;  %v798_v39 = vadd.f32 %v726_v38, %v268_v35  ;;  %v290_v37 = vld [vmem:[#allocation2 + $0x28] sm:$0xff] }
 0x13a   : > { %830 = vst [vmem:[#allocation2 + $0x68] sm:$0xff] %v798_v39  ;;  %v676_v40 = vpop.f32.mrf.mxu2 }
 0x13b   : > { %v765_v42 = vpop.f32.mrf.mxu3 }
 0x13c   : > { %v766_v43 = vadd.f32 %v765_v42, %v676_v40  ;;  %v639_v44 = vpop.f32.mrf.mxu0 }
 0x13d   : > { %v728_v46 = vpop.f32.mrf.mxu1 }
 0x13e   : > { %v814_v47 = vadd.f32 %v766_v43, %v284_v41  ;;  %v729_v48 = vadd.f32 %v728_v46, %v639_v44  ;;  %v275_v41 = vld [vmem:[#allocation2 + $0x60] sm:$0xff] }
 0x140   : > { %846 = vst [vmem:[#allocation2 + $0x90] sm:$0xff] %v814_v47  ;;  %v799_v49 = vadd.f32 %v729_v48, %v269_v45  ;;  %v291_v47 = vld [vmem:[#allocation2 + $0xa0] sm:$0xff] }
 0x142   : > { %831 = vst [vmem:[#allocation2 + $0x30] sm:$0xff] %v799_v49  ;;  %v679_v50 = vpop.f32.mrf.mxu2 }
 0x143   : > { %v768_v52 = vpop.f32.mrf.mxu3 }
 0x144   : > { %v769_v53 = vadd.f32 %v768_v52, %v679_v50  ;;  %v641_v54 = vpop.f32.mrf.mxu0 }
 0x145   : > { %v730_v56 = vpop.f32.mrf.mxu1 }
 0x146   : > { %v815_v57 = vadd.f32 %v769_v53, %v285_v51  ;;  %v731_v58 = vadd.f32 %v730_v56, %v641_v54  ;;  %v276_v51 = vld [vmem:[#allocation2 + $0xf0] sm:$0xff] }
 0x148   : > { %847 = vst [vmem:[#allocation2 + $0x70] sm:$0xff] %v815_v57  ;;  %v800_v59 = vadd.f32 %v731_v58, %v270_v55  ;;  %v292_v57 = vld [vmem:[#allocation2 + $0xf8] sm:$0xff] }
 0x14a   : > { %832 = vst [vmem:[#allocation2 + $0x48] sm:$0xff] %v800_v59  ;;  %v681_v60 = vpop.f32.mrf.mxu2 }
 0x14b   : > { %v770_v62 = vpop.f32.mrf.mxu3 }
 0x14c   : > { %v771_v63 = vadd.f32 %v770_v62, %v681_v60  ;;  %v644_v0 = vpop.f32.mrf.mxu0 }
 0x14d   : > { %v733_v2 = vpop.f32.mrf.mxu1 }
 0x14e   : > { %v816_v3 = vadd.f32 %v771_v63, %v286_v61  ;;  %v734_v4 = vadd.f32 %v733_v2, %v644_v0  ;;  %v277_v61 = vld [vmem:[#allocation2 + $0x8] sm:$0xff] }
 0x150   : > { %848 = vst [vmem:[#allocation2 + $0xc0] sm:$0xff] %v816_v3  ;;  %v801_v5 = vadd.f32 %v734_v4, %v271_v1  ;;  %v293_v3 = vld [vmem:[#allocation2 + $0x20] sm:$0xff] }
 0x152   : > { %833 = vst [vmem:[#allocation2 + $0x80] sm:$0xff] %v801_v5  ;;  %v684_v6 = vpop.f32.mrf.mxu2 }
 0x153   : > { %v773_v8 = vpop.f32.mrf.mxu3 }
 0x154   : > { %v774_v9 = vadd.f32 %v773_v8, %v684_v6  ;;  %v646_v10 = vpop.f32.mrf.mxu0 }
 0x155   : > { %v735_v12 = vpop.f32.mrf.mxu1 }
 0x156   : > { %v817_v13 = vadd.f32 %v774_v9, %v287_v7  ;;  %v736_v14 = vadd.f32 %v735_v12, %v646_v10  ;;  %v278_v7 = vld [vmem:[#allocation2 + $0x78] sm:$0xff] }
 0x158   : > { %849 = vst [vmem:[#allocation2 + $0xa8] sm:$0xff] %v817_v13  ;;  %v802_v15 = vadd.f32 %v736_v14, %v272_v11  ;;  %v294_v13 = vld [vmem:[#allocation2 + $0x98] sm:$0xff] }
 0x15a   : > { %834 = vst [vmem:[#allocation2 + $0x88] sm:$0xff] %v802_v15  ;;  %v686_v16 = vpop.f32.mrf.mxu2 }
 0x15b   : > { %v775_v18 = vpop.f32.mrf.mxu3 }
 0x15c   : > { %v776_v19 = vadd.f32 %v775_v18, %v686_v16  ;;  %v649_v20 = vpop.f32.mrf.mxu0 }
 0x15d   : > { %v738_v22 = vpop.f32.mrf.mxu1 }
 0x15e   : > { %v818_v23 = vadd.f32 %v776_v19, %v288_v17  ;;  %v739_v24 = vadd.f32 %v738_v22, %v649_v20 }
 0x160   : > { %850 = vst [vmem:[#allocation2 + $0xd0] sm:$0xff] %v818_v23  ;;  %v803_v25 = vadd.f32 %v739_v24, %v273_v21 }
 0x162   : > { %835 = vst [vmem:[#allocation2 + $0xe8] sm:$0xff] %v803_v25  ;;  %v689_v26 = vpop.f32.mrf.mxu2 }
 0x163   : > { %v778_v28 = vpop.f32.mrf.mxu3 }
 0x164   : > { %v779_v29 = vadd.f32 %v778_v28, %v689_v26  ;;  %v651_v30 = vpop.f32.mrf.mxu0 }
 0x165   : > { %v740_v32 = vpop.f32.mrf.mxu1 }
 0x166   : > { %v819_v33 = vadd.f32 %v779_v29, %v289_v27  ;;  %v741_v34 = vadd.f32 %v740_v32, %v651_v30 }
 0x168   : > { %851 = vst [vmem:[#allocation2 + $0x10] sm:$0xff] %v819_v33  ;;  %v804_v35 = vadd.f32 %v741_v34, %v274_v31 }
 0x16a   : > { %836 = vst [vmem:[#allocation2 + $0xb8] sm:$0xff] %v804_v35  ;;  %v691_v36 = vpop.f32.mrf.mxu2 }
 0x16b   : > { %v780_v38 = vpop.f32.mrf.mxu3 }
 0x16c   : > { %v781_v39 = vadd.f32 %v780_v38, %v691_v36  ;;  %v654_v40 = vpop.f32.mrf.mxu0 }
 0x16d   : > { %v743_v42 = vpop.f32.mrf.mxu1 }
 0x16e   : > { %v820_v43 = vadd.f32 %v781_v39, %v290_v37  ;;  %v744_v44 = vadd.f32 %v743_v42, %v654_v40 }
 0x170   : > { %852 = vst [vmem:[#allocation2 + $0x28] sm:$0xff] %v820_v43  ;;  %v805_v45 = vadd.f32 %v744_v44, %v275_v41 }
 0x172   : > { %837 = vst [vmem:[#allocation2 + $0x60] sm:$0xff] %v805_v45  ;;  %v694_v46 = vpop.f32.mrf.mxu2 }
 0x173   : > { %v783_v48 = vpop.f32.mrf.mxu3 }
 0x174   : > { %v784_v49 = vadd.f32 %v783_v48, %v694_v46  ;;  %v656_v50 = vpop.f32.mrf.mxu0 }
 0x175   : > { %v745_v52 = vpop.f32.mrf.mxu1 }
 0x176   : > { %v821_v53 = vadd.f32 %v784_v49, %v291_v47  ;;  %v746_v54 = vadd.f32 %v745_v52, %v656_v50 }
 0x178   : > { %853 = vst [vmem:[#allocation2 + $0xa0] sm:$0xff] %v821_v53  ;;  %v806_v55 = vadd.f32 %v746_v54, %v276_v51 }
 0x17a   : > { %838 = vst [vmem:[#allocation2 + $0xf0] sm:$0xff] %v806_v55  ;;  %v696_v56 = vpop.f32.mrf.mxu2 }
 0x17b   : > { %v785_v58 = vpop.f32.mrf.mxu3 }
 0x17c   : > { %v786_v59 = vadd.f32 %v785_v58, %v696_v56  ;;  %v659_v60 = vpop.f32.mrf.mxu0 }
 0x17d   : > { %v748_v62 = vpop.f32.mrf.mxu1 }
 0x17e   : > { %v822_v63 = vadd.f32 %v786_v59, %v292_v57  ;;  %v749_v0 = vadd.f32 %v748_v62, %v659_v60 }
 0x180   : > { %854 = vst [vmem:[#allocation2 + $0xf8] sm:$0xff] %v822_v63  ;;  %v807_v1 = vadd.f32 %v749_v0, %v277_v61 }
 0x182   : > { %839 = vst [vmem:[#allocation2 + $0x8] sm:$0xff] %v807_v1  ;;  %v699_v2 = vpop.f32.mrf.mxu2 }
 0x183   : > { %v788_v4 = vpop.f32.mrf.mxu3 }
 0x184   : > { %v789_v5 = vadd.f32 %v788_v4, %v699_v2  ;;  %v661_v6 = vpop.f32.mrf.mxu0 }
 0x185   : > { %v750_v8 = vpop.f32.mrf.mxu1 }
 0x186   : > { %v823_v9 = vadd.f32 %v789_v5, %v293_v3  ;;  %v751_v10 = vadd.f32 %v750_v8, %v661_v6 }
 0x188   : > { %855 = vst [vmem:[#allocation2 + $0x20] sm:$0xff] %v823_v9  ;;  %v808_v11 = vadd.f32 %v751_v10, %v278_v7 }
 0x18a   : > { %840 = vst [vmem:[#allocation2 + $0x78] sm:$0xff] %v808_v11  ;;  %v701_v12 = vpop.f32.mrf.mxu2 }
 0x18b   : > { %v790_v14 = vpop.f32.mrf.mxu3 }
 0x18c   : > { %v791_v15 = vadd.f32 %v790_v14, %v701_v12  ;;  %860 = sbr.rel (%p1292_p1) target bundleno = 420 (0x1a4), region = 44 }
 0x18e   : > { %v824_v16 = vadd.f32 %v791_v15, %v294_v13 }
 0x190   : > { %856 = vst [vmem:[#allocation2 + $0x98] sm:$0xff] %v824_v16 }
 0x191   : > { %v861_v17 = vld [vmem:[#allocation2 + $0xb0] sm:$0xff]  ;;  %v862_v18 = vld [vmem:[#allocation2] sm:$0xff]  ;;  %v863_v19 = vld [vmem:[#allocation2 + $0xd8] sm:$0xff] }
 0x192   : > { %v1352_v20 = vpack.c.bf16 %v862_v18, %v861_v17  ;;  %v864_v21 = vld [vmem:[#allocation2 + $0x18] sm:$0xff]  ;;  %v865_v22 = vld [vmem:[#allocation2 + $0x50] sm:$0xff]  ;;  %v866_v23 = vld [vmem:[#allocation2 + $0x68] sm:$0xff] }
 0x193   : > { %v1357_v24 = vpack.c.bf16 %v864_v21, %v863_v19  ;;  %v1362_v25 = vpack.c.bf16 %v866_v23, %v865_v22  ;;  %v867_v26 = vld [vmem:[#allocation2 + $0x30] sm:$0xff]  ;;  %v868_v27 = vld [vmem:[#allocation2 + $0x48] sm:$0xff]  ;;  %v869_v28 = vld [vmem:[#allocation2 + $0x80] sm:$0xff] }
 0x194   : > { %1353 = vst [vmem:[%s2022_s12] sm:$0xff] %v1352_v20   ;;  %v1367_v29 = vpack.c.bf16 %v868_v27, %v867_v26  ;;  %v870_v30 = vld [vmem:[#allocation2 + $0x88] sm:$0xff]  ;;  %v872_v32 = vld [vmem:[#allocation2 + $0xb8] sm:$0xff]  ;;  %v873_v35 = vld [vmem:[#allocation2 + $0x60] sm:$0xff] }
 0x195   : > { %v871_v31 = vld [vmem:[#allocation2 + $0xe8] sm:$0xff]  ;;  %1429 = vst [vmem:[%s2022_s12 + $0x8] sm:$0xff] %v1357_v24   ;;  %v1372_v33 = vpack.c.bf16 %v870_v30, %v869_v28  ;;  %v874_v36 = vld [vmem:[#allocation2 + $0xf0] sm:$0xff]  ;;  %v876_v39 = vld [vmem:[#allocation2 + $0x78] sm:$0xff] }
 0x196   : > { %v1377_v34 = vpack.c.bf16 %v872_v32, %v871_v31  ;;  %v875_v37 = vld [vmem:[#allocation2 + $0x8] sm:$0xff]  ;;  %1430 = vst [vmem:[%s2022_s12 + $0x10] sm:$0xff] %v1362_v25   ;;  %v1382_v38 = vpack.c.bf16 %v874_v36, %v873_v35  ;;  %v877_v40 = vld [vmem:[#allocation2 + $0x38] sm:$0xff]  ;;  %v879_v43 = vld [vmem:[#allocation2 + $0x40] sm:$0xff] }
 0x197   : > { %v878_v41 = vld [vmem:[#allocation2 + $0x58] sm:$0xff]  ;;  %1431 = vst [vmem:[%s2022_s12 + $0x18] sm:$0xff] %v1367_v29   ;;  %v1387_v42 = vpack.c.bf16 %v876_v39, %v875_v37  ;;  %v880_v44 = vld [vmem:[#allocation2 + $0xc8] sm:$0xff]  ;;  %v881_v45 = vld [vmem:[#allocation2 + $0xe0] sm:$0xff] }
 0x198   : > { %1432 = vst [vmem:[%s2022_s12 + $0x20] sm:$0xff] %v1372_v33   ;;  %v1392_v46 = vpack.c.bf16 %v878_v41, %v877_v40  ;;  %v882_v47 = vld [vmem:[#allocation2 + $0x90] sm:$0xff]  ;;  %v884_v49 = vld [vmem:[#allocation2 + $0xc0] sm:$0xff]  ;;  %v1397_v50 = vpack.c.bf16 %v880_v44, %v879_v43  ;;  %v885_v51 = vld [vmem:[#allocation2 + $0xa8] sm:$0xff] }
 0x199   : > { %v883_v48 = vld [vmem:[#allocation2 + $0x70] sm:$0xff]  ;;  %1433 = vst [vmem:[%s2022_s12 + $0x28] sm:$0xff] %v1377_v34   ;;  %v1402_v53 = vpack.c.bf16 %v882_v47, %v881_v45  ;;  %v888_v55 = vld [vmem:[#allocation2 + $0x28] sm:$0xff]  ;;  %v889_v57 = vld [vmem:[#allocation2 + $0xa0] sm:$0xff] }
 0x19a   : > { %v886_v52 = vld [vmem:[#allocation2 + $0xd0] sm:$0xff]  ;;  %1434 = vst [vmem:[%s2022_s12 + $0x30] sm:$0xff] %v1382_v38   ;;  %v1407_v56 = vpack.c.bf16 %v884_v49, %v883_v48  ;;  %v890_v58 = vld [vmem:[#allocation2 + $0xf8] sm:$0xff]  ;;  %v891_v60 = vld [vmem:[#allocation2 + $0x20] sm:$0xff] }
 0x19b   : > { %v887_v54 = vld [vmem:[#allocation2 + $0x10] sm:$0xff]  ;;  %1435 = vst [vmem:[%s2022_s12 + $0x38] sm:$0xff] %v1387_v42   ;;  %v1412_v59 = vpack.c.bf16 %v886_v52, %v885_v51  ;;  %v892_v61 = vld [vmem:[#allocation2 + $0x98] sm:$0xff]  ;;  %v1422_v63 = vpack.c.bf16 %v890_v58, %v889_v57 }
 0x19c   : > { %1436 = vst [vmem:[%s2022_s12 + $0x40] sm:$0xff] %v1392_v46   ;;  %v1417_v62 = vpack.c.bf16 %v888_v55, %v887_v54  ;;  %v1427_v0 = vpack.c.bf16 %v892_v61, %v891_v60 }
 0x19d   : > { %1437 = vst [vmem:[%s2022_s12 + $0x48] sm:$0xff] %v1397_v50  }
 0x19e   : > { %1438 = vst [vmem:[%s2022_s12 + $0x50] sm:$0xff] %v1402_v53  }
 0x19f   : > { %1439 = vst [vmem:[%s2022_s12 + $0x58] sm:$0xff] %v1407_v56  }
 0x1a0   : > { %1440 = vst [vmem:[%s2022_s12 + $0x60] sm:$0xff] %v1412_v59  }
 0x1a1   : > { %1441 = vst [vmem:[%s2022_s12 + $0x68] sm:$0xff] %v1417_v62  }
 0x1a2   : > { %1442 = vst [vmem:[%s2022_s12 + $0x70] sm:$0xff] %v1422_v63  }
 0x1a3   : > { %1443 = vst [vmem:[%s2022_s12 + $0x78] sm:$0xff] %v1427_v0  }
 0x1a4 PF: > { %s2219_s28 = sld [smem:[#allocation13_spill]]  ;;  %s970_s19 = sshll.u32 %s2022_s12, 4  ;;  %s971_s19 = int_to_ptr.vmem [resolvable:$true] %s970_s19 }
 0x1a5   : > { %s2220_s8 = sld [smem:[#allocation19_spill]]  ;;  %s958_s0 = scalar_lea.sflag [#allocation5], %s220_s20 }
 0x1aa   : > { %s1348_s4 = sshll.u32 %s2219_s28, 7 }
 0x1ab   : > { %s969_s23 = scalar_lea.hbm %s2220_s8, %s1348_s4  ;;  %s1679_s30 = scalar_lea.hbm %s2220_s8, 256 }
 0x1ac   : > { %s972_s27 = sshll.u32 %s969_s23, 4  ;;  %s973_s27 = int_to_ptr.hbm [resolvable:$true] %s972_s27 }
 0x1ad   : > { %s1673_s3 = sshra.s32 %s973_s27, 4  ;;  %s1674_s3 = int_to_ptr.hbm [resolvable:$true] %s1673_s3 }
 0x1ae   : > { %s1675_s21 = scalar_lea.hbm %s1674_s3, 128  ;;  %p1680_p8 = scmp.lt.s32.totalorder %s1674_s3, %s2220_s8 }
 0x1af   : > { %p1676_p3 = scmp.ne.s32.totalorder %s1674_s3, %s1675_s21  ;;  %p1681_p9 = scmp.lt.s32.totalorder %s1679_s30, %s1675_s21 }
 0x1b1   : > { %p1677_p4 = pnand %p1676_p3, %p1986_p6  ;;  %p1682_p10 = por %p1681_p9, %p1680_p8 }
 0x1b3   : > { %p1678_p7 = pneg %p1677_p4 }
 0x1b5   : > { %p1683_p5 = pnand %p1682_p10, %p1678_p7 }
 0x1b7   : > { %1686 = shalt.err (!%p1683_p5)
}
 0x1b8   : > { %s1817_s20 = smov 64   ;;  %s1818_s12 = smov 4  }
 0x1b9   : > { %1464 = dma.vmem_to_hbm [thread:$0]  (%p1986_p6), %s971_s19, 2048, %s973_s27, %s958_s0, %s1817_s20, %s1817_s20, %s1818_s12  }
 0x1ba PF: > { %p1478_p11 = scmp.ge.s32.totalorder %s1809_s22, 2  ;;  %s987_s4 = sand.u32 1, %s1757_s9  }
 0x1bb   : > { %s988_s29 = scalar_lea.sflag [#allocation5], %s987_s4 }
 0x1bc   : > { %p1474_p2 = pnand %p1478_p11, %p1991_p0 }
 0x1be   : > { %p1475_p13 = pneg %p1474_p2 }
 0x1c0   : > { %1752 = dma.done.wait (%p1475_p13), %s988_s29, 2048  }
 0x1c1   : > { %1754 = vsyncadd (%p1475_p13), %s988_s29, 4294965248  ;;  %s21_s22 = sadd.s32 1, %s1809_s22   ;;  %s2222_s18 = sld [smem:[#allocation14_spill]] }
 0x1c2   : > { %p2144_p12 = scmp.ge.s32.totalorder %s21_s22, 6   ;;  %s2223_s19 = sld [smem:[#allocation15_spill]] }
 0x1c3   : > { %s2224_s20 = sld [smem:[#allocation16_spill]]  ;;  %s2226_s9 = smov %s1761_s10 }
 0x1c4   : > { %s2225_s21 = sld [smem:[#allocation17_spill]]  ;;  %s2227_s10 = smov %s1765_s11 }
 0x1c5   : > { %s2228_s11 = smov %s1934_s5  ;;  %s2229_s12 = smov %s1773_s13 }
 0x1c6   : > { %s2230_s13 = smov %s1777_s14  ;;  %s2231_s14 = smov %s1970_s2 }
 0x1c7   : > { %s2232_s15 = smov %s1785_s16  ;;  %s2233_s16 = smov %s1789_s17 }
 0x1c8   : > { %s2234_s17 = smov %s1937_s6  ;;  %20 = sbr.rel (!%p2144_p12) target bundleno = 15 (0xf), region = 94 }
 0x1cd   :  { %994 = vsyncpa [#allocation4], 1 }
 0x1ce   :  { %996 = vsyncpa [#allocation4 + $0x1], 1 }
 0x1cf   :  { %997 = vsyncpa [#allocation7], 1 }
 0x1d0   :  { %999 = vsyncpa [#allocation7 + $0x1], 1 }
 0x1d1   :  { %1000 = vsyncpa [#allocation5], 1 }
 0x1d2   :  { %1002 = vsyncpa [#allocation5 + $0x1], 1 }

</bundles_post_ra>
